<compile_context>
chip_gen: v6e
topology: v6e:2x2x1
jax: 0.10.0
libtpu: 0.0.40
codegen_flags: <defaults>
</compile_context>

<pallas_src>
import jax
import jax.numpy as jnp
from jax.experimental import pallas as pl
from jax.experimental.pallas import tpu as pltpu


def film_kernel(g_ref, b_ref, x_ref, o_ref):
    # g_ref : (TILE_R, 1)       per-row (1 + gamma)
    # b_ref : (TILE_R, 1)       per-row beta
    # x_ref : (TILE_R, TILE_HW) feature tile
    # o_ref : (TILE_R, TILE_HW)
    o_ref[...] = x_ref[...] * g_ref[...] + b_ref[...]


def _round_down(x, m):
    return (x // m) * m


def _pick_tile(dim, align, target):
    """Tile size for one axis.

    Returns the full dim when it already fits the byte target (a full-array-dim
    block is always layout-legal), otherwise the largest `align`-multiple
    <= target, preferring exact divisors of `dim` so the grid has no ragged
    boundary block.  Never returns a tile larger than `dim`; if no aligned
    divisor exists the caller's pl.cdiv grid masks the boundary block.
    """
    if dim <= target or dim < align:
        return dim
    t = max(align, _round_down(target, align))
    cand = t
    while cand >= align:
        if dim % cand == 0:
            return cand
        cand -= align
    return t


def film_pallas(x, t_emb, weight, bias, *,
                block_bytes=4 * 1024 * 1024,
                min_pallas_bytes=512 * 1024,
                inplace=False):
    """FiLM forward: x * (1 + gamma) + beta, (gamma, beta) = Linear(t_emb).chunk(2).

    x      : (B, C, H, W)
    t_emb  : (B, T)
    weight : (2C, T)   -- PyTorch nn.Linear layout
    bias   : (2C,)
    """
    B, C, H, W = x.shape
    HW = H * W
    rows = B * C
    elt = jnp.dtype(x.dtype).itemsize

    # Hoisted tiny Linear: one small matmul for the whole batch, in f32.
    gb = (t_emb.astype(jnp.float32) @ weight.astype(jnp.float32).T
          + bias.astype(jnp.float32))                            # (B, 2C)
    gamma1 = (1.0 + gb[:, :C]).astype(x.dtype).reshape(rows, 1)  # (B*C, 1)
    beta = gb[:, C:].astype(x.dtype).reshape(rows, 1)            # (B*C, 1)

    # Small-tensor fallback: XLA fuses this elementwise for free, a pallas
    # launch would be pure overhead at toy/tail sizes.
    if rows * HW * elt < min_pallas_bytes:
        return (x * gamma1.reshape(B, C, 1, 1) + beta.reshape(B, C, 1, 1))

    x2d = x.reshape(rows, HW)

    # Dtype-aware sublane alignment: 8 for f32, 16 for bf16, 32 for int8/fp8.
    sub_align = max(8, 32 // elt)
    tile_r = _pick_tile(rows, sub_align, 256)
    lane_target = max(128, _round_down(block_bytes // max(1, tile_r * elt), 128))
    tile_hw = _pick_tile(HW, 128, lane_target)

    grid = (pl.cdiv(rows, tile_r), pl.cdiv(HW, tile_hw))

    # Megacore balance: if the tensor is big enough to be worth streaming but
    # the grid collapsed to a single step, halve the lane tile so both
    # TensorCores (v7x) get work.
    if (grid[0] * grid[1] < 2 and tile_hw >= 256
            and tile_r * tile_hw * elt >= (1 << 20)):
        tile_hw = max(128, _round_down(tile_hw // 2, 128))
        grid = (pl.cdiv(rows, tile_r), pl.cdiv(HW, tile_hw))

    extra = {}
    if inplace:
        # FiLM is safely in-place: let the output reuse x's HBM buffer.
        extra["input_output_aliases"] = {2: 0}

    out2d = pl.pallas_call(
        film_kernel,
        out_shape=jax.ShapeDtypeStruct((rows, HW), x.dtype),
        grid_spec=pltpu.PrefetchScalarGridSpec(
            num_scalar_prefetch=0,
            grid=grid,
            in_specs=[
                pl.BlockSpec((tile_r, 1), lambda i, j: (i, 0)),        # 1+gamma
                pl.BlockSpec((tile_r, 1), lambda i, j: (i, 0)),        # beta
                pl.BlockSpec((tile_r, tile_hw), lambda i, j: (i, j)),  # x tile
            ],
            out_specs=pl.BlockSpec((tile_r, tile_hw), lambda i, j: (i, j)),
        ),
        compiler_params=pltpu.CompilerParams(
            dimension_semantics=("parallel", "parallel"),
            # 4 MiB x/out blocks, double-buffered -> ~16 MiB; 32 MiB scoped
            # limit is valid on v5e/v6e (128 MiB physical) and v7x (64 MiB
            # physical) and lifts v5e's 16 MiB default.
            vmem_limit_bytes=32 * 1024 * 1024,
        ),
        **extra,
    )(gamma1, beta, x2d)

    return out2d.reshape(B, C, H, W)


def film_reference(x, t_emb, weight, bias):
    """Pure-JAX reference mirroring the PyTorch forward (weight is (2C, T))."""
    gb = t_emb @ weight.T + bias                    # (B, 2C)
    C = x.shape[1]
    gamma = gb[:, :C][..., None, None]              # (B, C, 1, 1)
    beta = gb[:, C:][..., None, None]
    return x * (1 + gamma) + beta


if __name__ == "__main__":
    # Shapes consistent with the module's forward:
    #   x:     (batch=2, in_channels=4, H=16, W=16)
    #   t_emb: (batch=2, time_dim=8)
    B, C, H, W, T = 2, 4, 16, 16, 8

    key = jax.random.PRNGKey(0)
    kx, kt, kw, kb = jax.random.split(key, 4)

    x = jax.random.normal(kx, (B, C, H, W), dtype=jnp.float32)
    t_emb = jax.random.normal(kt, (B, T), dtype=jnp.float32)

    # nn.Linear(time_dim, in_channels * 2): weight (2C, T), bias (2C,).
    bound = 1.0 / (T ** 0.5)
    weight = jax.random.uniform(kw, (2 * C, T), minval=-bound, maxval=bound,
                                dtype=jnp.float32)
    bias = jax.random.uniform(kb, (2 * C,), minval=-bound, maxval=bound,
                              dtype=jnp.float32)

    ref = film_reference(x, t_emb, weight, bias)

    # Force the Pallas path even at this toy size (the default wrapper
    # behavior would take the fused plain-JAX fallback below 512 KiB).
    out = film_pallas(x, t_emb, weight, bias, min_pallas_bytes=0)
    jax.block_until_ready(out)
    assert out.shape == (B, C, H, W)
    assert jnp.allclose(out, ref, atol=1e-5, rtol=1e-5), "pallas path mismatch"

    # Also exercise the small-tensor fallback path with default thresholds.
    out_fb = film_pallas(x, t_emb, weight, bias)
    jax.block_until_ready(out_fb)
    assert jnp.allclose(out_fb, ref, atol=1e-5, rtol=1e-5), "fallback mismatch"

    print("KERNEL_OK")
</pallas_src>

<mosaic_0001>
module attributes {stable_mosaic.version = 11 : i64} {
  func.func @film_kernel(%arg0: i32, %arg1: i32, %arg2: memref<8x1xf32, #tpu.memory_space<vmem>>, %arg3: memref<8x1xf32, #tpu.memory_space<vmem>>, %arg4: memref<8x256xf32, #tpu.memory_space<vmem>>, %arg5: memref<8x256xf32, #tpu.memory_space<vmem>>) attributes {dimension_semantics = [#tpu.dimension_semantics<parallel>, #tpu.dimension_semantics<parallel>], iteration_bounds = array<i64: 1, 1>, scalar_prefetch = 0 : i64, scratch_operands = 0 : i64, tpu.core_type = #tpu.core_type<tc>, window_params = [{transform_indices = @transform_0, window_bounds = array<i64: 8, 1>}, {transform_indices = @transform_1, window_bounds = array<i64: 8, 1>}, {transform_indices = @transform_2, window_bounds = array<i64: 8, 256>}, {transform_indices = @transform_3, window_bounds = array<i64: 8, 256>}]} {
    %c0 = arith.constant 0 : index
    %c0_0 = arith.constant 0 : index
    %0 = vector.load %arg4[%c0, %c0_0] : memref<8x256xf32, #tpu.memory_space<vmem>>, vector<8x256xf32>
    %c0_1 = arith.constant 0 : index
    %c0_2 = arith.constant 0 : index
    %1 = vector.load %arg2[%c0_1, %c0_2] : memref<8x1xf32, #tpu.memory_space<vmem>>, vector<8x1xf32>
    %2 = vector.broadcast %1 : vector<8x1xf32> to vector<8x256xf32>
    %3 = arith.mulf %0, %2 : vector<8x256xf32>
    %c0_3 = arith.constant 0 : index
    %c0_4 = arith.constant 0 : index
    %4 = vector.load %arg3[%c0_3, %c0_4] : memref<8x1xf32, #tpu.memory_space<vmem>>, vector<8x1xf32>
    %5 = vector.broadcast %4 : vector<8x1xf32> to vector<8x256xf32>
    %6 = arith.addf %3, %5 : vector<8x256xf32>
    %c0_5 = arith.constant 0 : index
    %c0_6 = arith.constant 0 : index
    %7 = vector.load %arg5[%c0_5, %c0_6] : memref<8x256xf32, #tpu.memory_space<vmem>>, vector<8x256xf32>
    tpu.vector_store %arg5[%c0_5, %c0_6], %6 {strides = array<i32>} : memref<8x256xf32, #tpu.memory_space<vmem>>, vector<8x256xf32>,
    return
  }
  func.func @transform_0(%arg0: i32, %arg1: i32) -> (i32, i32) {
    %c0_i32 = arith.constant 0 : i32
    %c0_i32_0 = arith.constant 0 : i32
    return %arg0, %c0_i32 : i32, i32
  }
  func.func @transform_1(%arg0: i32, %arg1: i32) -> (i32, i32) {
    %c0_i32 = arith.constant 0 : i32
    %c0_i32_0 = arith.constant 0 : i32
    return %arg0, %c0_i32 : i32, i32
  }
  func.func @transform_2(%arg0: i32, %arg1: i32) -> (i32, i32) {
    %c0_i32 = arith.constant 0 : i32
    return %arg0, %arg1 : i32, i32
  }
  func.func @transform_3(%arg0: i32, %arg1: i32) -> (i32, i32) {
    %c0_i32 = arith.constant 0 : i32
    return %arg0, %arg1 : i32, i32
  }
}

</mosaic_0001>

<bundles_post_ra>
// kernel: tpu_custom_call.1
= control target key start
LH: loop header
LB: loop body
LE: loop exit
PB: predicated region body
PF: predicated region fallthrough
CT: control target
= control target key end

     0   :  { %v74_v1 = vmov 0   ;;  %s111_s0 = inlined_call_operand.vmem [shape: f32[8,1], index: 0, kind: input, shape index: {}]   ;;  %s112_s1 = inlined_call_operand.vmem [shape: f32[8,1], index: 1, kind: input, shape index: {}]   ;;  %s113_s2 = inlined_call_operand.vmem [shape: f32[8,256], index: 2, kind: input, shape index: {}]   ;;  %s114_s3 = inlined_call_operand.hbm [shape: f32[8,256], index: 3, kind: output, shape index: {}]  }
   0x1   :  { %v17_v0 = vld [vmem:[%s111_s0] sm:$0xff]  ;;  %51 = vset.pattern.permute.xlu0 %v74_v1 }
   0x2   :  { %8 = vsyncpa [#allocation3], 0  ;;  %20 = vperm.xlu0 %51, %v17_v0   ;;  %v25_v2 = vld [vmem:[%s112_s1] sm:$0xff]  ;;  %v16_v5 = vld [vmem:[%s113_s2 + $0x8] sm:$0xff]  ;;  %s75_s20 = smov [#allocation2]  }
   0x3   :  { %v15_v4 = vld [vmem:[%s113_s2] sm:$0xff]  ;;  %s41_s0 = sshll.u32 %s75_s20, 4  ;;  %s42_s0 = int_to_ptr.vmem [resolvable:$true] %s41_s0 }
   0x4   :  { %s52_s1 = scalar_lea.vmem %s42_s0, 256  ;;  %p57_p1 = scmp.lt.s32.totalorder %s42_s0, %s42_s0 }
   0x5   :  { %p53_p0 = scmp.ne.s32.totalorder %s42_s0, %s52_s1  ;;  %p58_p2 = scmp.lt.s32.totalorder %s52_s1, %s52_s1 }
   0x6   :  { %28 = vperm.xlu0 %51, %v25_v2  }
   0x7   :  { %p59_p3 = por %p58_p2, %p57_p1 }
   0x9   :  { %p60_p4 = pnand %p59_p3, %p53_p0 }
  0x7d   :  { %v21_v3 = vpop.permute.xlu0 %20 }
  0x7e   :  { %v23_v6 = vmul.f32 %v21_v3, %v15_v4  ;;  %v24_v7 = vmul.f32 %v21_v3, %v16_v5 }
  0x81   :  { %v29_v8 = vpop.permute.xlu0 %28 }
  0x82   :  { %v31_v9 = vadd.f32 %v29_v8, %v23_v6  ;;  %v32_v10 = vadd.f32 %v29_v8, %v24_v7 }
  0x84   :  { %33 = vst [vmem:[#allocation2] sm:$0xff] %v31_v9  ;;  %34 = vst [vmem:[#allocation2 + $0x8] sm:$0xff] %v32_v10 }
  0x85   :  { %63 = shalt.err (!%p60_p4)
}
  0x86   :  { %44 = dma.vmem_to_hbm [thread:$0]  %s42_s0, 256, %s114_s3, [#allocation3]  }
  0x87   :  { %72 = dma.done.wait [#allocation3], 256  }
  0x88   :  { %73 = vsyncadd [#allocation3], 4294967040 }
  0x89   :  { %48 = vsyncpa [#allocation3], 1 }

</bundles_post_ra>
